<compile_context>
chip_gen: v5e
topology: v5e:2x2
jax: 0.10.0
libtpu: 0.0.40
codegen_flags: <defaults>
</compile_context>

<pallas_src>
import functools

import jax
import jax.numpy as jnp
from jax import lax
from jax.experimental import pallas as pl
from jax.experimental.pallas import tpu as pltpu


def _round_up(x, n):
    return ((x + n - 1) // n) * n


def _gen_targets_kernel(gt_ref, aux_ref, out_ref, *, m, tile):
    """One (hw-tile, batch) grid step.

    gt_ref : [1, M, 5]    per gt box: x0, y0, x1, y1, class
    aux_ref: [5, TILE]    rows: x, y, limit_lo, limit_hi, radiu
    out_ref: [1, 8, TILE] f32 rows: cls, cnt, l, t, r, b, 0, 0
    """
    f32 = jnp.float32

    aux = aux_ref[...]                                   # [5, TILE]
    x = aux[0:1, :]                                      # [1, TILE]
    y = aux[1:2, :]
    limit_lo = aux[2:3, :]
    limit_hi = aux[3:4, :]
    radiu = aux[4:5, :]

    gt = gt_ref[0]                                       # [M, 5]
    x0 = gt[:, 0:1]                                      # [M, 1]
    y0 = gt[:, 1:2]
    x1 = gt[:, 2:3]
    y1 = gt[:, 3:4]
    cls_f = gt[:, 4:5]

    l_off = x - x0                                       # [M, TILE]
    t_off = y - y0
    r_off = x1 - x
    b_off = y1 - y

    # same formula as the torch reference (bit-exact tie behavior)
    areas = (l_off + r_off) * (t_off + b_off)
    off_min = jnp.minimum(jnp.minimum(l_off, t_off), jnp.minimum(r_off, b_off))
    off_max = jnp.maximum(jnp.maximum(l_off, t_off), jnp.maximum(r_off, b_off))

    mask_in_gtboxes = off_min > 0.0
    mask_in_level = (off_max > limit_lo) & (off_max <= limit_hi)

    cx = (x0 + x1) * 0.5                                 # [M, 1]
    cy = (y0 + y1) * 0.5
    c_off_max = jnp.maximum(jnp.maximum(x - cx, cx - x),
                            jnp.maximum(y - cy, cy - y))
    mask_center = c_off_max < radiu

    mask_pos = mask_in_gtboxes & mask_in_level & mask_center   # [M, TILE]
    areas_m = jnp.where(mask_pos, areas, 99999999.0)

    # argmin over gt boxes (first index on ties, matching torch.min indices)
    m_iota = lax.broadcasted_iota(jnp.int32, (m, tile), 0).astype(f32)
    min_area = jnp.min(areas_m, axis=0, keepdims=True)          # [1, TILE]
    cand = jnp.where(areas_m == min_area, m_iota, float(m))
    first = jnp.min(cand, axis=0, keepdims=True)                # [1, TILE]
    one_hot = (m_iota == first).astype(f32)                     # [M, TILE]

    # Select the winning gt box's raw columns (one non-zero term -> exact);
    # this ends the live range of the big [M,TILE] offset arrays above.
    sel_x0 = jnp.sum(x0 * one_hot, axis=0, keepdims=True)       # [1, TILE]
    sel_y0 = jnp.sum(y0 * one_hot, axis=0, keepdims=True)
    sel_x1 = jnp.sum(x1 * one_hot, axis=0, keepdims=True)
    sel_y1 = jnp.sum(y1 * one_hot, axis=0, keepdims=True)
    cls_sel = jnp.sum(cls_f * one_hot, axis=0, keepdims=True)   # exact int vals

    reg_l = x - sel_x0                                          # == l_off[winner]
    reg_t = y - sel_y0
    reg_r = sel_x1 - x
    reg_b = sel_y1 - y

    lr_min = jnp.minimum(reg_l, reg_r)
    lr_max = jnp.maximum(reg_l, reg_r)
    tb_min = jnp.minimum(reg_t, reg_b)
    tb_max = jnp.maximum(reg_t, reg_b)
    # clamp keeps the (later masked-out) negative-location values finite
    cnt = jnp.sqrt(jnp.maximum(lr_min * tb_min, 0.0) /
                   (lr_max * tb_max + 1e-10))                   # [1, TILE]

    has_pos = jnp.sum(mask_pos.astype(f32), axis=0, keepdims=True) >= 0.5

    reg_all = jnp.concatenate([reg_l, reg_t, reg_r, reg_b], axis=0)   # [4, TILE]
    rows = jnp.concatenate([
        jnp.where(has_pos, cls_sel, 0.0),          # row 0: cls (as f32)
        jnp.where(has_pos, cnt, -1.0),             # row 1: cnt
        jnp.where(has_pos, reg_all, -1.0),         # rows 2-5: l, t, r, b
        jnp.zeros((2, tile), f32),                 # rows 6-7: padding
    ], axis=0)                                     # [8, TILE]
    out_ref[0] = rows                              # single full-slab store


def _pick_tile(m, hw_total, b):
    """M-aware HW tile: big tiles for small M, scaled down as M grows."""
    if m <= 16:
        cap = 2048
    else:
        cap = max(256, ((32768 // m) // 128) * 128)
    t = min(cap, _round_up(hw_total, 128))
    if b == 1:
        # keep at least 2 hw tiles so both v7x TensorCores get work
        t = min(t, max(128, _round_up((hw_total + 1) // 2, 128)))
    return t


def gen_targets_fused(level_shapes, gt_boxes, classes, strides, limit_ranges,
                      sample_radiu_ratio=1.5, tile=None):
    """All FPN levels in a single pallas_call; lane-dense in-kernel layout."""
    b, m, _ = gt_boxes.shape

    xs, ys, los, his, rads = [], [], [], [], []
    hw_total = 0
    for (h, w), stride, (lo, hi) in zip(level_shapes, strides, limit_ranges):
        # coords_fmap2orig: x = (n % w)*stride + stride//2, y = (n // w)*stride + stride//2
        sx = jnp.arange(w, dtype=jnp.float32) * stride + stride // 2
        sy = jnp.arange(h, dtype=jnp.float32) * stride + stride // 2
        yy, xx = jnp.meshgrid(sy, sx, indexing="ij")
        xs.append(xx.reshape(-1))
        ys.append(yy.reshape(-1))
        hw = h * w
        los.append(jnp.full((hw,), float(lo), jnp.float32))
        his.append(jnp.full((hw,), float(hi), jnp.float32))
        rads.append(jnp.full((hw,), float(stride) * sample_radiu_ratio,
                             jnp.float32))
        hw_total += hw

    tile_hw = int(tile) if tile is not None else _pick_tile(m, hw_total, b)
    tile_hw = max(128, (tile_hw // 128) * 128)
    tile_hw = min(tile_hw, _round_up(hw_total, 128))
    hw_pad = _round_up(hw_total, tile_hw)
    pad = hw_pad - hw_total

    def cat_pad(rows, pad_val):
        r = jnp.concatenate(rows)
        return jnp.pad(r, (0, pad), constant_values=pad_val)

    # padded locations get x=y=-1e8 so every positivity mask is false there;
    # 5 rows only (no zero-filler rows): x, y, limit_lo, limit_hi, radiu.
    aux = jnp.stack([cat_pad(xs, -1e8), cat_pad(ys, -1e8),
                     cat_pad(los, 0.0), cat_pad(his, -1.0),
                     cat_pad(rads, 0.0)], axis=0)                 # [5, HWp]

    gt_aug = jnp.concatenate(
        [gt_boxes.astype(jnp.float32),
         classes.astype(jnp.float32).reshape(b, m, 1)], axis=-1)  # [B, M, 5]

    kernel = functools.partial(_gen_targets_kernel, m=m, tile=tile_hw)
    num_tiles = hw_pad // tile_hw

    out = pl.pallas_call(
        kernel,
        out_shape=jax.ShapeDtypeStruct((b, 8, hw_pad), jnp.float32),
        grid_spec=pltpu.PrefetchScalarGridSpec(
            num_scalar_prefetch=0,
            # hw-tile axis OUTER, batch INNER: aux block index is constant
            # across consecutive steps -> fetched once per tile, not per batch.
            grid=(num_tiles, b),
            in_specs=[
                pl.BlockSpec((1, m, 5), lambda t, i: (i, 0, 0)),
                pl.BlockSpec((5, tile_hw), lambda t, i: (0, t)),
            ],
            out_specs=pl.BlockSpec((1, 8, tile_hw), lambda t, i: (i, 0, t)),
        ),
        compiler_params=pltpu.CompilerParams(
            dimension_semantics=("parallel", "parallel")),
    )(gt_aug, aux)

    # lane-dense kernel layout -> module contract [B, sum(HW), C]
    out = out[:, :, :hw_total]
    cls_t = jnp.transpose(out[:, 0:1, :], (0, 2, 1)).astype(jnp.int32)
    cnt_t = jnp.transpose(out[:, 1:2, :], (0, 2, 1))
    reg_t = jnp.transpose(out[:, 2:6, :], (0, 2, 1))
    return cls_t, cnt_t, reg_t


class GenTargets:
    """JAX/Pallas port of the PyTorch GenTargets module."""

    def __init__(self, strides, limit_range):
        assert len(strides) == len(limit_range)
        self.strides = strides
        self.limit_range = limit_range

    def __call__(self, inputs):
        cls_logits, cnt_logits, reg_preds = inputs[0]
        gt_boxes = inputs[1]
        classes = inputs[2]
        assert len(self.strides) == len(cls_logits)
        # NCHW: only (H, W) of the per-level logits is consumed
        level_shapes = [(l.shape[2], l.shape[3]) for l in cls_logits]
        return gen_targets_fused(level_shapes, gt_boxes, classes,
                                 self.strides, self.limit_range)


# ---------------- pure-JAX reference (mirrors the torch code) ----------------
def _ref_level(shape_hw, gt_boxes, classes, stride, limit_range, ratio=1.5):
    h, w = shape_hw
    sx = (jnp.arange(w, dtype=jnp.float32) * stride + stride // 2)
    sy = (jnp.arange(h, dtype=jnp.float32) * stride + stride // 2)
    yy, xx = jnp.meshgrid(sy, sx, indexing='ij')
    cxs = xx.reshape(-1)
    cys = yy.reshape(-1)
    l_off = cxs[None, :, None] - gt_boxes[..., 0][:, None, :]
    t_off = cys[None, :, None] - gt_boxes[..., 1][:, None, :]
    r_off = gt_boxes[..., 2][:, None, :] - cxs[None, :, None]
    b_off = gt_boxes[..., 3][:, None, :] - cys[None, :, None]
    ltrb = jnp.stack([l_off, t_off, r_off, b_off], -1)
    areas = (ltrb[..., 0] + ltrb[..., 2]) * (ltrb[..., 1] + ltrb[..., 3])
    off_min = ltrb.min(-1)
    off_max = ltrb.max(-1)
    mask_in = off_min > 0
    mask_lv = (off_max > limit_range[0]) & (off_max <= limit_range[1])
    radiu = stride * ratio
    gcx = (gt_boxes[..., 0] + gt_boxes[..., 2]) / 2
    gcy = (gt_boxes[..., 1] + gt_boxes[..., 3]) / 2
    c_l = cxs[None, :, None] - gcx[:, None, :]
    c_t = cys[None, :, None] - gcy[:, None, :]
    c_r = gcx[:, None, :] - cxs[None, :, None]
    c_b = gcy[:, None, :] - cys[None, :, None]
    c_max = jnp.stack([c_l, c_t, c_r, c_b], -1).max(-1)
    mask_pos = mask_in & mask_lv & (c_max < radiu)
    areas = jnp.where(mask_pos, areas, 99999999.0)
    idx = jnp.argmin(areas, axis=-1)
    bsz = gt_boxes.shape[0]
    b_idx = jnp.arange(bsz)[:, None]
    n_idx = jnp.arange(h * w)[None, :]
    reg = ltrb[b_idx, n_idx, idx]
    cls_t = classes[b_idx, idx][..., None].astype(jnp.int32)
    lr_min = jnp.minimum(reg[..., 0], reg[..., 2])
    lr_max = jnp.maximum(reg[..., 0], reg[..., 2])
    tb_min = jnp.minimum(reg[..., 1], reg[..., 3])
    tb_max = jnp.maximum(reg[..., 1], reg[..., 3])
    cnt = jnp.sqrt(jnp.maximum(lr_min * tb_min, 0.0) /
                   (lr_max * tb_max + 1e-10))[..., None]
    mask2 = mask_pos.sum(-1) >= 1
    cls_t = jnp.where(mask2[..., None], cls_t, 0)
    cnt = jnp.where(mask2[..., None], cnt, -1.0)
    reg = jnp.where(mask2[..., None], reg, -1.0)
    return cls_t, cnt, reg


if __name__ == "__main__":
    key = jax.random.PRNGKey(0)
    B, C, M = 2, 4, 8
    strides = [8, 16]
    limit_range = [[-1, 64], [64, 999999]]
    spatial = [(16, 16), (8, 8)]            # image is 128x128

    k1, k2, k3, k4, k5, k6 = jax.random.split(key, 6)
    cls_logits = [jax.random.normal(k1, (B, C, h, w), jnp.float32)
                  for (h, w) in spatial]
    cnt_logits = [jax.random.normal(k2, (B, 1, h, w), jnp.float32)
                  for (h, w) in spatial]
    reg_preds = [jax.random.normal(k3, (B, 4, h, w), jnp.float32)
                 for (h, w) in spatial]

    xy0 = jax.random.uniform(k4, (B, M, 2), minval=0.0, maxval=80.0)
    wh = jax.random.uniform(k5, (B, M, 2), minval=10.0, maxval=60.0)
    gt_boxes = jnp.concatenate([xy0, jnp.minimum(xy0 + wh, 127.0)], axis=-1)
    classes = jax.random.randint(k6, (B, M), 1, C + 1, dtype=jnp.int32)

    gen = GenTargets(strides, limit_range)
    cls_t, cnt_t, reg_t = gen([[cls_logits, cnt_logits, reg_preds],
                               gt_boxes, classes])
    jax.block_until_ready((cls_t, cnt_t, reg_t))

    # sanity check against a pure-JAX mirror of the torch code
    refs = [_ref_level(s, gt_boxes, classes, st, lr)
            for s, st, lr in zip(spatial, strides, limit_range)]
    ref_cls = jnp.concatenate([r[0] for r in refs], axis=1)
    ref_cnt = jnp.concatenate([r[1] for r in refs], axis=1)
    ref_reg = jnp.concatenate([r[2] for r in refs], axis=1)
    assert cls_t.shape == (B, sum(h * w for h, w in spatial), 1)
    assert cnt_t.shape == (B, sum(h * w for h, w in spatial), 1)
    assert reg_t.shape == (B, sum(h * w for h, w in spatial), 4)
    assert bool((cls_t == ref_cls).all())
    assert bool(jnp.allclose(cnt_t, ref_cnt, atol=1e-5))
    assert bool(jnp.allclose(reg_t, ref_reg, atol=1e-4))

    print("KERNEL_OK")
</pallas_src>

<mosaic_0001>
module attributes {stable_mosaic.version = 11 : i64} {
  func.func @_gen_targets_kernel(%arg0: i32, %arg1: i32, %arg2: memref<1x8x5xf32, #tpu.memory_space<vmem>>, %arg3: memref<5x384xf32, #tpu.memory_space<vmem>>, %arg4: memref<1x8x384xf32, #tpu.memory_space<vmem>>) attributes {dimension_semantics = [#tpu.dimension_semantics<parallel>, #tpu.dimension_semantics<parallel>], iteration_bounds = array<i64: 1, 2>, scalar_prefetch = 0 : i64, scratch_operands = 0 : i64, tpu.core_type = #tpu.core_type<tc>, window_params = [{transform_indices = @transform_0, window_bounds = array<i64: 1, 8, 5>}, {transform_indices = @transform_1, window_bounds = array<i64: 5, 384>}, {transform_indices = @transform_2, window_bounds = array<i64: 1, 8, 384>}]} {
    %c0 = arith.constant 0 : index
    %c0_0 = arith.constant 0 : index
    %0 = vector.load %arg3[%c0, %c0_0] : memref<5x384xf32, #tpu.memory_space<vmem>>, vector<5x384xf32>
    %1 = vector.extract_strided_slice %0 {offsets = [0, 0], sizes = [1, 384], strides = [1, 1]} : vector<5x384xf32> to vector<1x384xf32>
    %2 = vector.extract_strided_slice %0 {offsets = [1, 0], sizes = [1, 384], strides = [1, 1]} : vector<5x384xf32> to vector<1x384xf32>
    %3 = vector.extract_strided_slice %0 {offsets = [2, 0], sizes = [1, 384], strides = [1, 1]} : vector<5x384xf32> to vector<1x384xf32>
    %4 = vector.extract_strided_slice %0 {offsets = [3, 0], sizes = [1, 384], strides = [1, 1]} : vector<5x384xf32> to vector<1x384xf32>
    %5 = vector.extract_strided_slice %0 {offsets = [4, 0], sizes = [1, 384], strides = [1, 1]} : vector<5x384xf32> to vector<1x384xf32>
    %c0_1 = arith.constant 0 : index
    %c0_2 = arith.constant 0 : index
    %c0_3 = arith.constant 0 : index
    %6 = vector.load %arg2[%c0_1, %c0_2, %c0_3] : memref<1x8x5xf32, #tpu.memory_space<vmem>>, vector<1x8x5xf32>
    %7 = vector.shape_cast %6 : vector<1x8x5xf32> to vector<8x5xf32>
    %8 = vector.extract_strided_slice %7 {offsets = [0, 0], sizes = [8, 1], strides = [1, 1]} : vector<8x5xf32> to vector<8x1xf32>
    %9 = vector.extract_strided_slice %7 {offsets = [0, 1], sizes = [8, 1], strides = [1, 1]} : vector<8x5xf32> to vector<8x1xf32>
    %10 = vector.extract_strided_slice %7 {offsets = [0, 2], sizes = [8, 1], strides = [1, 1]} : vector<8x5xf32> to vector<8x1xf32>
    %11 = vector.extract_strided_slice %7 {offsets = [0, 3], sizes = [8, 1], strides = [1, 1]} : vector<8x5xf32> to vector<8x1xf32>
    %12 = vector.extract_strided_slice %7 {offsets = [0, 4], sizes = [8, 1], strides = [1, 1]} : vector<8x5xf32> to vector<8x1xf32>
    %13 = vector.broadcast %1 : vector<1x384xf32> to vector<8x384xf32>
    %14 = vector.broadcast %8 : vector<8x1xf32> to vector<8x384xf32>
    %15 = arith.subf %13, %14 : vector<8x384xf32>
    %16 = vector.broadcast %2 : vector<1x384xf32> to vector<8x384xf32>
    %17 = vector.broadcast %9 : vector<8x1xf32> to vector<8x384xf32>
    %18 = arith.subf %16, %17 : vector<8x384xf32>
    %19 = vector.broadcast %10 : vector<8x1xf32> to vector<8x384xf32>
    %20 = vector.broadcast %1 : vector<1x384xf32> to vector<8x384xf32>
    %21 = arith.subf %19, %20 : vector<8x384xf32>
    %22 = vector.broadcast %11 : vector<8x1xf32> to vector<8x384xf32>
    %23 = vector.broadcast %2 : vector<1x384xf32> to vector<8x384xf32>
    %24 = arith.subf %22, %23 : vector<8x384xf32>
    %25 = arith.addf %15, %21 : vector<8x384xf32>
    %26 = arith.addf %18, %24 : vector<8x384xf32>
    %27 = arith.mulf %25, %26 : vector<8x384xf32>
    %28 = arith.minimumf %15, %18 : vector<8x384xf32>
    %29 = arith.minimumf %21, %24 : vector<8x384xf32>
    %30 = arith.minimumf %28, %29 : vector<8x384xf32>
    %31 = arith.maximumf %15, %18 : vector<8x384xf32>
    %32 = arith.maximumf %21, %24 : vector<8x384xf32>
    %33 = arith.maximumf %31, %32 : vector<8x384xf32>
    %cst = arith.constant 0.000000e+00 : f32
    %34 = vector.broadcast %cst : f32 to vector<8x384xf32>
    %35 = arith.cmpf ogt, %30, %34 : vector<8x384xf32>
    %36 = vector.broadcast %3 : vector<1x384xf32> to vector<8x384xf32>
    %37 = arith.cmpf ogt, %33, %36 : vector<8x384xf32>
    %38 = vector.broadcast %4 : vector<1x384xf32> to vector<8x384xf32>
    %39 = arith.cmpf ole, %33, %38 : vector<8x384xf32>
    %40 = arith.andi %37, %39 : vector<8x384xi1>
    %41 = arith.addf %8, %10 : vector<8x1xf32>
    %cst_4 = arith.constant 5.000000e-01 : f32
    %42 = vector.broadcast %cst_4 : f32 to vector<8x1xf32>
    %43 = arith.mulf %41, %42 : vector<8x1xf32>
    %44 = arith.addf %9, %11 : vector<8x1xf32>
    %cst_5 = arith.constant 5.000000e-01 : f32
    %45 = vector.broadcast %cst_5 : f32 to vector<8x1xf32>
    %46 = arith.mulf %44, %45 : vector<8x1xf32>
    %47 = vector.broadcast %1 : vector<1x384xf32> to vector<8x384xf32>
    %48 = vector.broadcast %43 : vector<8x1xf32> to vector<8x384xf32>
    %49 = arith.subf %47, %48 : vector<8x384xf32>
    %50 = vector.broadcast %43 : vector<8x1xf32> to vector<8x384xf32>
    %51 = vector.broadcast %1 : vector<1x384xf32> to vector<8x384xf32>
    %52 = arith.subf %50, %51 : vector<8x384xf32>
    %53 = arith.maximumf %49, %52 : vector<8x384xf32>
    %54 = vector.broadcast %2 : vector<1x384xf32> to vector<8x384xf32>
    %55 = vector.broadcast %46 : vector<8x1xf32> to vector<8x384xf32>
    %56 = arith.subf %54, %55 : vector<8x384xf32>
    %57 = vector.broadcast %46 : vector<8x1xf32> to vector<8x384xf32>
    %58 = vector.broadcast %2 : vector<1x384xf32> to vector<8x384xf32>
    %59 = arith.subf %57, %58 : vector<8x384xf32>
    %60 = arith.maximumf %56, %59 : vector<8x384xf32>
    %61 = arith.maximumf %53, %60 : vector<8x384xf32>
    %62 = vector.broadcast %5 : vector<1x384xf32> to vector<8x384xf32>
    %63 = arith.cmpf olt, %61, %62 : vector<8x384xf32>
    %64 = arith.andi %35, %40 : vector<8x384xi1>
    %65 = arith.andi %64, %63 : vector<8x384xi1>
    %cst_6 = arith.constant 1.000000e+08 : f32
    %66 = vector.broadcast %cst_6 : f32 to vector<8x384xf32>
    %67 = arith.select %65, %27, %66 : vector<8x384xi1>, vector<8x384xf32>
    %68 = tpu.iota {dimensions = array<i32: 0>} : vector<8x384xi32>
    %69 = arith.sitofp %68 : vector<8x384xi32> to vector<8x384xf32>
    %cst_7 = arith.constant dense<0x7F800000> : vector<384xf32>
    %70 = vector.multi_reduction <minimumf>, %67, %cst_7 [0] : vector<8x384xf32> to vector<384xf32>
    %71 = vector.shape_cast %70 : vector<384xf32> to vector<1x384xf32>
    %72 = vector.broadcast %71 : vector<1x384xf32> to vector<8x384xf32>
    %73 = arith.cmpf oeq, %67, %72 : vector<8x384xf32>
    %cst_8 = arith.constant 8.000000e+00 : f32
    %74 = vector.broadcast %cst_8 : f32 to vector<8x384xf32>
    %75 = arith.select %73, %69, %74 : vector<8x384xi1>, vector<8x384xf32>
    %cst_9 = arith.constant dense<0x7F800000> : vector<384xf32>
    %76 = vector.multi_reduction <minimumf>, %75, %cst_9 [0] : vector<8x384xf32> to vector<384xf32>
    %77 = vector.shape_cast %76 : vector<384xf32> to vector<1x384xf32>
    %78 = vector.broadcast %77 : vector<1x384xf32> to vector<8x384xf32>
    %79 = arith.cmpf oeq, %69, %78 : vector<8x384xf32>
    %80 = arith.extui %79 : vector<8x384xi1> to vector<8x384xi32>
    %81 = arith.sitofp %80 : vector<8x384xi32> to vector<8x384xf32>
    %82 = vector.broadcast %8 : vector<8x1xf32> to vector<8x384xf32>
    %83 = arith.mulf %82, %81 : vector<8x384xf32>
    %cst_10 = arith.constant dense<0.000000e+00> : vector<384xf32>
    %84 = vector.multi_reduction <add>, %83, %cst_10 [0] : vector<8x384xf32> to vector<384xf32>
    %85 = vector.shape_cast %84 : vector<384xf32> to vector<1x384xf32>
    %86 = vector.broadcast %9 : vector<8x1xf32> to vector<8x384xf32>
    %87 = arith.mulf %86, %81 : vector<8x384xf32>
    %cst_11 = arith.constant dense<0.000000e+00> : vector<384xf32>
    %88 = vector.multi_reduction <add>, %87, %cst_11 [0] : vector<8x384xf32> to vector<384xf32>
    %89 = vector.shape_cast %88 : vector<384xf32> to vector<1x384xf32>
    %90 = vector.broadcast %10 : vector<8x1xf32> to vector<8x384xf32>
    %91 = arith.mulf %90, %81 : vector<8x384xf32>
    %cst_12 = arith.constant dense<0.000000e+00> : vector<384xf32>
    %92 = vector.multi_reduction <add>, %91, %cst_12 [0] : vector<8x384xf32> to vector<384xf32>
    %93 = vector.shape_cast %92 : vector<384xf32> to vector<1x384xf32>
    %94 = vector.broadcast %11 : vector<8x1xf32> to vector<8x384xf32>
    %95 = arith.mulf %94, %81 : vector<8x384xf32>
    %cst_13 = arith.constant dense<0.000000e+00> : vector<384xf32>
    %96 = vector.multi_reduction <add>, %95, %cst_13 [0] : vector<8x384xf32> to vector<384xf32>
    %97 = vector.shape_cast %96 : vector<384xf32> to vector<1x384xf32>
    %98 = vector.broadcast %12 : vector<8x1xf32> to vector<8x384xf32>
    %99 = arith.mulf %98, %81 : vector<8x384xf32>
    %cst_14 = arith.constant dense<0.000000e+00> : vector<384xf32>
    %100 = vector.multi_reduction <add>, %99, %cst_14 [0] : vector<8x384xf32> to vector<384xf32>
    %101 = vector.shape_cast %100 : vector<384xf32> to vector<1x384xf32>
    %102 = arith.subf %1, %85 : vector<1x384xf32>
    %103 = arith.subf %2, %89 : vector<1x384xf32>
    %104 = arith.subf %93, %1 : vector<1x384xf32>
    %105 = arith.subf %97, %2 : vector<1x384xf32>
    %106 = arith.minimumf %102, %104 : vector<1x384xf32>
    %107 = arith.maximumf %102, %104 : vector<1x384xf32>
    %108 = arith.minimumf %103, %105 : vector<1x384xf32>
    %109 = arith.maximumf %103, %105 : vector<1x384xf32>
    %110 = arith.mulf %106, %108 : vector<1x384xf32>
    %cst_15 = arith.constant 0.000000e+00 : f32
    %111 = vector.broadcast %cst_15 : f32 to vector<1x384xf32>
    %112 = arith.maximumf %110, %111 : vector<1x384xf32>
    %113 = arith.mulf %107, %109 : vector<1x384xf32>
    %cst_16 = arith.constant 1.000000e-10 : f32
    %114 = vector.broadcast %cst_16 : f32 to vector<1x384xf32>
    %115 = arith.addf %113, %114 : vector<1x384xf32>
    %116 = arith.divf %112, %115 : vector<1x384xf32>
    %117 = math.sqrt %116 : vector<1x384xf32>
    %118 = arith.extui %65 : vector<8x384xi1> to vector<8x384xi32>
    %119 = arith.sitofp %118 : vector<8x384xi32> to vector<8x384xf32>
    %cst_17 = arith.constant dense<0.000000e+00> : vector<384xf32>
    %120 = vector.multi_reduction <add>, %119, %cst_17 [0] : vector<8x384xf32> to vector<384xf32>
    %121 = vector.shape_cast %120 : vector<384xf32> to vector<1x384xf32>
    %cst_18 = arith.constant 5.000000e-01 : f32
    %122 = vector.broadcast %cst_18 : f32 to vector<1x384xf32>
    %123 = arith.cmpf oge, %121, %122 : vector<1x384xf32>
    %124 = tpu.concatenate %102, %103, %104, %105 in 0 : vector<1x384xf32>, vector<1x384xf32>, vector<1x384xf32>, vector<1x384xf32> -> vector<4x384xf32>
    %cst_19 = arith.constant 0.000000e+00 : f32
    %125 = vector.broadcast %cst_19 : f32 to vector<1x384xf32>
    %126 = arith.select %123, %101, %125 : vector<1x384xi1>, vector<1x384xf32>
    %cst_20 = arith.constant -1.000000e+00 : f32
    %127 = vector.broadcast %cst_20 : f32 to vector<1x384xf32>
    %128 = arith.select %123, %117, %127 : vector<1x384xi1>, vector<1x384xf32>
    %cst_21 = arith.constant -1.000000e+00 : f32
    %129 = vector.shape_cast %123 : vector<1x384xi1> to vector<1x384xi1>
    %130 = vector.broadcast %129 : vector<1x384xi1> to vector<4x384xi1>
    %131 = vector.broadcast %cst_21 : f32 to vector<4x384xf32>
    %132 = arith.select %130, %124, %131 : vector<4x384xi1>, vector<4x384xf32>
    %cst_22 = arith.constant 0.000000e+00 : f32
    %133 = vector.broadcast %cst_22 : f32 to vector<2x384xf32>
    %134 = tpu.concatenate %126, %128, %132, %133 in 0 : vector<1x384xf32>, vector<1x384xf32>, vector<4x384xf32>, vector<2x384xf32> -> vector<8x384xf32>
    %c0_23 = arith.constant 0 : index
    %c0_24 = arith.constant 0 : index
    %c0_25 = arith.constant 0 : index
    %135 = vector.load %arg4[%c0_23, %c0_24, %c0_25] : memref<1x8x384xf32, #tpu.memory_space<vmem>>, vector<1x8x384xf32>
    %136 = vector.shape_cast %135 : vector<1x8x384xf32> to vector<8x384xf32>
    %137 = vector.shape_cast %134 : vector<8x384xf32> to vector<1x8x384xf32>
    tpu.vector_store %arg4[%c0_23, %c0_24, %c0_25], %137 {strides = array<i32>} : memref<1x8x384xf32, #tpu.memory_space<vmem>>, vector<1x8x384xf32>,
    return
  }
  func.func @transform_0(%arg0: i32, %arg1: i32) -> (i32, i32, i32) {
    %c0_i32 = arith.constant 0 : i32
    %c0_i32_0 = arith.constant 0 : i32
    %c0_i32_1 = arith.constant 0 : i32
    return %arg1, %c0_i32, %c0_i32_0 : i32, i32, i32
  }
  func.func @transform_1(%arg0: i32, %arg1: i32) -> (i32, i32) {
    %c0_i32 = arith.constant 0 : i32
    %c0_i32_0 = arith.constant 0 : i32
    return %c0_i32, %arg0 : i32, i32
  }
  func.func @transform_2(%arg0: i32, %arg1: i32) -> (i32, i32, i32) {
    %c0_i32 = arith.constant 0 : i32
    %c0_i32_0 = arith.constant 0 : i32
    return %arg1, %c0_i32, %arg0 : i32, i32, i32
  }
}

</mosaic_0001>

<bundles_post_ra>
// kernel: tpu_custom_call.1
= control target key start
LH: loop header
LB: loop body
LE: loop exit
PB: predicated region body
PF: predicated region fallthrough
CT: control target
= control target key end

     0   :  { %7 = vsyncpa [#allocation3], 0  ;;  %s1548_s0 = inlined_call_operand.vmem [shape: f32[2,8,5], index: 0, kind: input, shape index: {}]   ;;  %s1549_s1 = inlined_call_operand.vmem [shape: f32[5,384], index: 1, kind: input, shape index: {}]   ;;  %s1550_s2 = inlined_call_operand.hbm [shape: f32[2,8,384], index: 2, kind: output, shape index: {}]  }
   0x1   :  { %9 = vsyncpa [#allocation3 + $0x1], 0  ;;  %s1017_s9 = smov 0   ;;  %s1019_s10 = smov 0  }
   0x2   :  { %s1021_s11 = smov 0   ;;  %s1023_s12 = smov 0  }
   0x3   :  { %s1025_s13 = smov 0   ;;  %s1027_s14 = smov 0  }
   0x4 LB: > { %s815_s15 = sadd.s32 4294967295, %s993_s14   ;;  %s816_s16 = sadd.s32 4294967294, %s993_s14   ;;  %s993_s14 = sphi %s1027_s14, %s15_s14   ;;  %s989_s13 = sphi %s1025_s13, %s1581_s13   ;;  %s985_s12 = sphi %s1023_s12, %s1580_s12   ;;  %s981_s11 = sphi %s1021_s11, %s1579_s11   ;;  %s977_s10 = sphi %s1019_s10, %s1578_s10   ;;  %s973_s9 = sphi %s1017_s9, %s1577_s9  }
   0x5   : > { %s24_s17 = sadd.s32 1, %s989_s13  ;;  %s88_s18 = sadd.s32 1, %s981_s11 }
   0x6   : > { %p25_p0 = scmp.ge.s32.totalorder %s24_s17, 2  ;;  %p98_p1 = scmp.ne.s32.totalorder %s981_s11, %s977_s10 }
   0x7   : > { %p99_p2 = scmp.eq.s32.totalorder %s815_s15, 1  ;;  %p104_p3 = scmp.ne.s32.totalorder %s977_s10, %s973_s9 }
   0x8   : > { %s1583_s17 = smov (%p25_p0, %s24_s17), 0  ;;  %p105_p5 = scmp.eq.s32.totalorder %s816_s16, 1 }
   0x9   : > { %p1057_p4 = por %p99_p2, %p98_p1  ;;  %s83_s20 = ssub.s32 %s989_s13, %s1583_s17 }
   0xa   : > { %p820_p6 = scmp.ge.s32.totalorder %s993_s14, 1  ;;  %p86_p7 = scmp.eq.s32.totalorder %s83_s20, 0 }
   0xb   : > { %p1064_p8 = por %p105_p5, %p104_p3  ;;  %p139_p9 = scmp.lt.s32.totalorder %s993_s14, 3 }
   0xc   : > { %s1070_s22 = scalar_select %p86_p7, %s981_s11, %s88_s18  }
   0xd   : > { %p140_p10 = pnand %p820_p6, %p139_p9 }
   0xe   : > { %p165_p11 = scmp.lt.s32.totalorder (!%p140_p10), %s985_s12, 1  ;;  %s998_s28 = smov (!%p140_p10), 126  }
   0xf   : > { %143 = sbr.rel (%p140_p10) target bundleno = 380 (0x17c), region = 28  ;;  %s162_s7 = sand.u32 (!%p140_p10), 1, %s977_s10  }
  0x10   : > { %s1469_s8 = smul.u32 (!%p140_p10), 24, %s162_s7  ;;  %s712_s25 = scalar_lea.sflag (!%p140_p10), [#allocation3], %s162_s7 }
  0x11   : > { %s832_s15 = smul.u32 (!%p140_p10), 24, %s985_s12  ;;  %s935_s30 = scalar_lea.hbm (!%p140_p10), %s1550_s2, 48 }
  0x12   : > { %s164_s20 = scalar_lea.vmem (!%p140_p10), [#allocation2], %s1469_s8 }
  0x13   : > { %s725_s18 = scalar_lea.hbm (!%p140_p10), %s1550_s2, %s832_s15 }
  0x14   : > { %v995_v0 = vmov 1   ;;  %v996_v1 = vmov 0   ;;  %s166_s23 = scalar_select %p165_p11, %s985_s12, 1  ;;  %v997_v2 = vmov 3   ;;  %v999_v4 = vmov 2  }
  0x15   : > { %896 = vset.pattern.permute.xlu1 %v995_v0  ;;  %895 = vset.pattern.permute.xlu0 %v996_v1  ;;  %v1000_v5 = vmov 4   ;;  %v1082_v10 = vld [vmem:[%s1549_s1] sm:$0x1f]  ;;  %v1087_v11 = vld [vmem:[%s1549_s1 + $0x8] sm:$0x1f] }
  0x16   : > { %898 = vset.pattern.permute.xlu2 %v997_v2  ;;  %s821_s24 = sshll.u32 %s166_s23, 3  ;;  %v1092_v12 = vld [vmem:[%s1549_s1 + $0x10] sm:$0x1f]  ;;  %v1095_v13 = vperm.slane %v1082_v10, 1  ;;  %v1098_v14 = vperm.slane %v1087_v11, 1  ;;  %v1108_v18 = vperm.slane %v1082_v10, 0 }
  0x17   : > { %s168_s27 = scalar_lea.vmem %s1548_s0, %s821_s24  ;;  %v1105_v17 = vperm.slane %v1092_v12, 1  ;;  %v1113_v20 = vperm.slane %v1087_v11, 0  ;;  %v1116_v21 = vperm.slane %v1092_v12, 0  ;;  %v245_v43 = vperm.slane %v1082_v10, 2  ;;  %s727_s23 = sshll.u32 %s164_s20, 4  ;;  %s728_s23 = int_to_ptr.vmem [resolvable:$true] %s727_s23 }
  0x18   : > { %v179_v3 = vld [vmem:[%s168_s27] sm:$0xff]  ;;  %v246_v44 = vperm.slane %v1087_v11, 2  ;;  %v251_v49 = vperm.slane %v1082_v10, 3  ;;  %v252_v50 = vperm.slane %v1087_v11, 3  ;;  %v247_v53 = vperm.slane %v1092_v12, 2  ;;  %s729_s24 = sshll.u32 %s725_s18, 4  ;;  %s730_s24 = int_to_ptr.hbm [resolvable:$true] %s729_s24 }
  0x19   : > { %260 = vrot.lane.b32.xlu0 %v179_v3, %s998_s28  ;;  %195 = vperm.xlu1 %896, %v179_v3   ;;  %v253_v54 = vperm.slane %v1092_v12, 3  ;;  %v295_v63 = vperm.slane %v1082_v10, 4  ;;  %s929_s26 = sshra.s32 %s730_s24, 4  ;;  %s930_s26 = int_to_ptr.hbm [resolvable:$true] %s929_s26 }
  0x1a   : > { %209 = vperm.xlu2 %898, %v179_v3   ;;  %s931_s27 = scalar_lea.hbm %s930_s26, 24  ;;  %p936_p1 = scmp.lt.s32.totalorder %s930_s26, %s1550_s2 }
  0x1b   : > { %p932_p12 = scmp.ne.s32.totalorder %s930_s26, %s931_s27  ;;  %p937_p2 = scmp.lt.s32.totalorder %s935_s30, %s931_s27 }
  0x1d   : > { %p933_p13 = pnand %p932_p12, %p1057_p4  ;;  %p938_p3 = por %p937_p2, %p936_p1 }
  0x1f   : > { %p934_p0 = pneg %p933_p13 }
  0x21   : > { %897 = vset.pattern.permute.xlu1 %v999_v4  ;;  %185 = vperm.xlu0 %895, %v179_v3   ;;  %p939_p5 = pnand %p938_p3, %p934_p0 }
  0x22   : > { %202 = vperm.xlu1 %897, %v179_v3   ;;  %899 = vset.pattern.permute.xlu2 %v996_v1 }
  0x29   : > { %902 = vset.pattern.permute.xlu0 %v1000_v5 }
  0x2a   : > { %900 = vset.pattern.permute.xlu1 %v995_v0 }
  0x74   : > { %v1110_v19 = vpop.permute.xlu2 %209 }
  0x75   : > { %v212_v22 = vsub.f32 %v1110_v19, %v1095_v13  ;;  %v213_v26 = vsub.f32 %v1110_v19, %v1098_v14  ;;  %v1136_v30 = vsub.f32 %v1110_v19, %v1105_v17 }
  0x8b   : > { %v261_v6 = vpop.permute.xlu0 %260  ;;  %v1077_v9 = vpop.permute.xlu1 %195 }
  0x8c   : > { %v263_v7 = vadd.f32 %v261_v6, %v179_v3  ;;  %v198_v23 = vsub.f32 %v1095_v13, %v1077_v9  ;;  %v199_v27 = vsub.f32 %v1098_v14, %v1077_v9  ;;  %v1140_v31 = vsub.f32 %v1105_v17, %v1077_v9 }
  0x8e   : > { %v264_v8 = vmul.f32 0.5, %v263_v7  ;;  %v218_v56 = vadd.f32 %v212_v22, %v198_v23  ;;  %v219_v57 = vadd.f32 %v213_v26, %v199_v27 }
  0x90   : > { %280 = vperm.xlu1 %900, %v264_v8   ;;  %267 = vperm.xlu2 %899, %v264_v8  }
  0x93   : > { %v1102_v16 = vpop.permute.xlu0 %185 }
  0x94   : > { %v1100_v15 = vpop.permute.xlu1 %202  ;;  %v188_v25 = vsub.f32 %v1108_v18, %v1102_v16  ;;  %v189_v29 = vsub.f32 %v1113_v20, %v1102_v16  ;;  %v1148_v33 = vsub.f32 %v1116_v21, %v1102_v16 }
  0x95   : > { %v205_v24 = vsub.f32 %v1100_v15, %v1108_v18  ;;  %v206_v28 = vsub.f32 %v1100_v15, %v1113_v20  ;;  %v1144_v32 = vsub.f32 %v1100_v15, %v1116_v21 }
  0x96   : > { %v224_v35 = vmin.f32 %v188_v25, %v198_v23  ;;  %v233_v38 = vmax.f32 %v188_v25, %v198_v23  ;;  %v234_v39 = vmax.f32 %v189_v29, %v199_v27  ;;  %v235_v41 = vmax.f32 %v1148_v33, %v1140_v31 }
  0x97   : > { %v227_v34 = vmin.f32 %v205_v24, %v212_v22  ;;  %v236_v36 = vmax.f32 %v205_v24, %v212_v22  ;;  %v237_v37 = vmax.f32 %v206_v28, %v213_v26  ;;  %v238_v40 = vmax.f32 %v1144_v32, %v1136_v30 }
  0x98   : > { %901 = vset.pattern.permute.xlu2 %v1000_v5  ;;  %v228_v42 = vmin.f32 %v206_v28, %v213_v26  ;;  %v229_v45 = vmin.f32 %v1144_v32, %v1136_v30  ;;  %v225_v46 = vmin.f32 %v189_v29, %v199_v27  ;;  %v226_v47 = vmin.f32 %v1148_v33, %v1140_v31 }
  0x99   : > { %449 = vperm.xlu2 %901, %v179_v3   ;;  %v230_v48 = vmin.f32 %v224_v35, %v227_v34  ;;  %v239_v51 = vmax.f32 %v233_v38, %v236_v36  ;;  %v240_v52 = vmax.f32 %v234_v39, %v237_v37  ;;  %v241_v55 = vmax.f32 %v235_v41, %v238_v40 }
  0x9a   : > { %v215_v59 = vadd.f32 %v205_v24, %v188_v25  ;;  %v216_v60 = vadd.f32 %v206_v28, %v189_v29  ;;  %v231_v61 = vmin.f32 %v225_v46, %v228_v42  ;;  %v232_v62 = vmin.f32 %v226_v47, %v229_v45 }
  0x9b   : > { %vm242_vm0 = vcmp.gt.f32.partialorder %v230_v48, 0.0  ;;  %vm1165_vm1 = vcmp.gt.f32.partialorder %v239_v51, %v245_v43  ;;  %vm1169_vm2 = vcmp.gt.f32.partialorder %v240_v52, %v246_v44  ;;  %vm1173_vm3 = vcmp.le.f32.partialorder %v239_v51, %v251_v49 }
  0x9c   : > { %vm1177_vm4 = vcmp.le.f32.partialorder %v240_v52, %v252_v50  ;;  %vm1183_vm5 = vcmp.gt.f32.partialorder %v241_v55, %v247_v53  ;;  %vm1187_vm6 = vcmp.le.f32.partialorder %v241_v55, %v253_v54  ;;  %vm243_vm7 = vcmp.gt.f32.partialorder %v231_v61, 0.0  ;;  %vm257_vm9 = vmand %vm1165_vm1, %vm1173_vm3 }
  0x9d   : > { %vm244_vm8 = vcmp.gt.f32.partialorder %v232_v62, 0.0  ;;  %v296_v34 = vperm.slane %v1087_v11, 4  ;;  %v297_v35 = vperm.slane %v1092_v12, 4  ;;  %vm258_vm10 = vmand %vm1169_vm2, %vm1177_vm4  ;;  %v220_v38 = vadd.f32 %v1136_v30, %v1140_v31 }
  0x9e   : > { %vm259_vm11 = vmand %vm1183_vm5, %vm1187_vm6  ;;  %v217_v39 = vadd.f32 %v1144_v32, %v1148_v33  ;;  %v221_v30 = vmul.f32 %v218_v56, %v215_v59  ;;  %v222_v33 = vmul.f32 %v219_v57, %v216_v60  ;;  %v310_v53 = vlaneseq }
  0x9f   : > { %vm1225_vm12 = vmand %vm242_vm0, %vm257_vm9 }
  0xa0   : > { %vm1230_vm13 = vmand %vm243_vm7, %vm258_vm10  ;;  %v223_v47 = vmul.f32 %v220_v38, %v217_v39  ;;  %v311_v60 = vshrl.u32 %v310_v53, 7 }
  0xa1   : > { %vm1239_vm15 = vmand %vm244_vm8, %vm259_vm11 }
  0xa2   : > { %v312_v2 = vcvt.s32.f32 %v311_v60 }
  0xea   : > { %v268_v58 = vpop.permute.xlu2 %267 }
  0xeb   : > { %v270_v4 = vsub.f32 %v1108_v18, %v268_v58  ;;  %v273_v5 = vsub.f32 %v268_v58, %v1108_v18  ;;  %v271_v8 = vsub.f32 %v1113_v20, %v268_v58  ;;  %v272_v22 = vsub.f32 %v1116_v21, %v268_v58 }
  0xec   : > { %v274_v23 = vsub.f32 %v268_v58, %v1113_v20  ;;  %v275_v24 = vsub.f32 %v268_v58, %v1116_v21 }
  0xed   : > { %v276_v29 = vmax.f32 %v270_v4, %v273_v5 }
  0xee   : > { %v277_v36 = vmax.f32 %v271_v8, %v274_v23  ;;  %v278_v37 = vmax.f32 %v272_v22, %v275_v24 }
 0x102   : > { %v281_v25 = vpop.permute.xlu1 %280 }
 0x103   : > { %v283_v26 = vsub.f32 %v1095_v13, %v281_v25  ;;  %v284_v18 = vsub.f32 %v1098_v14, %v281_v25  ;;  %v285_v27 = vsub.f32 %v1105_v17, %v281_v25  ;;  %v286_v28 = vsub.f32 %v281_v25, %v1095_v13 }
 0x104   : > { %v287_v20 = vsub.f32 %v281_v25, %v1098_v14  ;;  %v288_v21 = vsub.f32 %v281_v25, %v1105_v17 }
 0x105   : > { %v289_v13 = vmax.f32 %v283_v26, %v286_v28 }
 0x106   : > { %v290_v14 = vmax.f32 %v284_v18, %v287_v20  ;;  %v291_v17 = vmax.f32 %v285_v27, %v288_v21 }
 0x107   : > { %v292_v40 = vmax.f32 %v276_v29, %v289_v13 }
 0x108   : > { %v293_v42 = vmax.f32 %v277_v36, %v290_v14  ;;  %v294_v43 = vmax.f32 %v278_v37, %v291_v17 }
 0x109   : > { %vm1234_vm14 = vcmp.lt.f32.partialorder %v292_v40, %v295_v63  ;;  %v1001_v40 = vmov 0.0  }
 0x10a   : > { %vm1243_vm0 = vcmp.lt.f32.partialorder %v293_v42, %v296_v34  ;;  %vm1247_vm1 = vcmp.lt.f32.partialorder %v294_v43, %v297_v35  ;;  %vm304_vm2 = vmand %vm1225_vm12, %vm1234_vm14 }
 0x10b   : > { %vm305_vm3 = vmand %vm1230_vm13, %vm1243_vm0  ;;  %v307_v48 = vsel %vm304_vm2, %v221_v30, 1e+08 }
 0x10c   : > { %vm306_vm4 = vmand %vm1239_vm15, %vm1247_vm1  ;;  %v308_v49 = vsel %vm305_vm3, %v222_v33, 1e+08  ;;  %v313_v50 = vrot.slane %v307_v48, 4 }
 0x10d   : > { %v309_v51 = vsel %vm306_vm4, %v223_v47, 1e+08  ;;  %v319_v52 = vrot.slane %v308_v49, 4  ;;  %v827_v41 = vsel %vm306_vm4, 1.0, %v1001_v40 }
 0x10e   : > { %v314_v54 = vmin.f32 %v307_v48, %v313_v50  ;;  %v325_v55 = vrot.slane %v309_v51, 4 }
 0x10f   : > { %v320_v56 = vmin.f32 %v308_v49, %v319_v52 }
 0x110   : > { %v315_v57 = vrot.slane %v314_v54, 2  ;;  %v326_v58 = vmin.f32 %v309_v51, %v325_v55 }
 0x111   : > { %v321_v59 = vrot.slane %v320_v56, 2 }
 0x112   : > { %v316_v61 = vmin.f32 %v314_v54, %v315_v57  ;;  %v327_v62 = vrot.slane %v326_v58, 2 }
 0x113   : > { %v322_v63 = vmin.f32 %v320_v56, %v321_v59 }
 0x114   : > { %v328_v0 = vmin.f32 %v326_v58, %v327_v62  ;;  %v317_v1 = vrot.slane %v316_v61, 1 }
 0x115   : > { %v323_v3 = vrot.slane %v322_v63, 1 }
 0x116   : > { %v318_v4 = vmin.f32 %v316_v61, %v317_v1  ;;  %v329_v5 = vrot.slane %v328_v0, 1 }
 0x117   : > { %v324_v6 = vmin.f32 %v322_v63, %v323_v3 }
 0x118   : > { %v330_v7 = vmin.f32 %v328_v0, %v329_v5  ;;  %vm331_vm5 = vcmp.eq.f32.partialorder %v307_v48, %v318_v4 }
 0x119   : > { %vm332_vm6 = vcmp.eq.f32.partialorder %v308_v49, %v324_v6  ;;  %v334_v8 = vsel %vm331_vm5, %v312_v2, 8.0 }
 0x11a   : > { %vm333_vm7 = vcmp.eq.f32.partialorder %v309_v51, %v330_v7  ;;  %v335_v22 = vsel %vm332_vm6, %v312_v2, 8.0  ;;  %v337_v23 = vrot.slane %v334_v8, 4 }
 0x11b   : > { %v336_v24 = vsel %vm333_vm7, %v312_v2, 8.0  ;;  %v343_v25 = vrot.slane %v335_v22, 4  ;;  %vm653_vm7 = vcmask 1040384  }
 0x11c   : > { %v338_v26 = vmin.f32 %v334_v8, %v337_v23  ;;  %v349_v18 = vrot.slane %v336_v24, 4 }
 0x11d   : > { %v344_v27 = vmin.f32 %v335_v22, %v343_v25 }
 0x11e   : > { %v339_v28 = vrot.slane %v338_v26, 2  ;;  %v350_v20 = vmin.f32 %v336_v24, %v349_v18 }
 0x11f   : > { %v345_v21 = vrot.slane %v344_v27, 2 }
 0x120   : > { %v340_v29 = vmin.f32 %v338_v26, %v339_v28  ;;  %v351_v34 = vrot.slane %v350_v20, 2 }
 0x121   : > { %v346_v35 = vmin.f32 %v344_v27, %v345_v21 }
 0x122   : > { %v341_v13 = vrot.slane %v340_v29, 1  ;;  %v352_v36 = vmin.f32 %v350_v20, %v351_v34 }
 0x123   : > { %v347_v37 = vrot.slane %v346_v35, 1 }
 0x124   : > { %v342_v14 = vmin.f32 %v340_v29, %v341_v13  ;;  %v353_v17 = vrot.slane %v352_v36, 1 }
 0x125   : > { %v348_v38 = vmin.f32 %v346_v35, %v347_v37 }
 0x126   : > { %v354_v39 = vmin.f32 %v352_v36, %v353_v17  ;;  %vm355_vm8 = vcmp.eq.f32.partialorder %v312_v2, %v342_v14 }
 0x127   : > { %vm356_vm9 = vcmp.eq.f32.partialorder %v312_v2, %v348_v38  ;;  %v1279_v42 = vsel %vm355_vm8, 1.0, %v1001_v40  ;;  %vm657_vm8 = vcmask 1041408  }
 0x128   : > { %vm357_vm10 = vcmp.eq.f32.partialorder %v312_v2, %v354_v39  ;;  %v1282_v43 = vsel %vm356_vm9, 1.0, %v1001_v40  ;;  %v364_v30 = vmul.f32 %v1279_v42, %v1102_v16  ;;  %v385_v33 = vmul.f32 %v1279_v42, %v1077_v9 }
 0x129   : > { %v1289_v47 = vsel %vm357_vm10, 1.0, %v1001_v40  ;;  %v365_v48 = vmul.f32 %v1282_v43, %v1102_v16  ;;  %v386_v49 = vmul.f32 %v1282_v43, %v1077_v9  ;;  %v406_v50 = vmul.f32 %v1279_v42, %v1100_v15 }
 0x12a   : > { %v366_v51 = vmul.f32 %v1289_v47, %v1102_v16  ;;  %v367_v52 = vrot.slane %v364_v30, 4  ;;  %v387_v53 = vmul.f32 %v1289_v47, %v1077_v9  ;;  %v388_v54 = vrot.slane %v385_v33, 4 }
 0x12b   : > { %v373_v55 = vrot.slane %v365_v48, 4  ;;  %v394_v56 = vrot.slane %v386_v49, 4  ;;  %v407_v57 = vmul.f32 %v1282_v43, %v1100_v15  ;;  %v409_v60 = vrot.slane %v406_v50, 4 }
 0x12c   : > { %v400_v58 = vrot.slane %v387_v53, 4  ;;  %v368_v59 = vadd.f32 %v367_v52, %v364_v30  ;;  %v379_v62 = vrot.slane %v366_v51, 4  ;;  %v389_v63 = vadd.f32 %v388_v54, %v385_v33 }
 0x12d   : > { %v415_v61 = vrot.slane %v407_v57, 4  ;;  %v374_v0 = vadd.f32 %v373_v55, %v365_v48  ;;  %v395_v1 = vadd.f32 %v394_v56, %v386_v49  ;;  %v410_v16 = vadd.f32 %v409_v60, %v406_v50 }
 0x12e   : > { %v401_v2 = vadd.f32 %v400_v58, %v387_v53  ;;  %v369_v3 = vrot.slane %v368_v59, 2  ;;  %v380_v5 = vadd.f32 %v379_v62, %v366_v51  ;;  %v390_v9 = vrot.slane %v389_v63, 2 }
 0x12f   : > { %v416_v4 = vadd.f32 %v415_v61, %v407_v57  ;;  %v408_v6 = vmul.f32 %v1289_v47, %v1100_v15  ;;  %v375_v7 = vrot.slane %v374_v0, 2  ;;  %v396_v8 = vrot.slane %v395_v1, 2 }
 0x130   : > { %v402_v22 = vrot.slane %v401_v2, 2  ;;  %v411_v23 = vrot.slane %v410_v16, 2  ;;  %v370_v24 = vadd.f32 %v369_v3, %v368_v59  ;;  %v381_v26 = vrot.slane %v380_v5, 2 }
 0x131   : > { %v417_v25 = vrot.slane %v416_v4, 2  ;;  %v391_v18 = vadd.f32 %v390_v9, %v389_v63  ;;  %v421_v27 = vrot.slane %v408_v6, 4  ;;  %v427_v28 = vmul.f32 %v1279_v42, %v1110_v19 }
 0x132   : > { %v376_v20 = vadd.f32 %v375_v7, %v374_v0  ;;  %v397_v21 = vadd.f32 %v396_v8, %v395_v1  ;;  %v428_v29 = vmul.f32 %v1282_v43, %v1110_v19  ;;  %v429_v15 = vmul.f32 %v1289_v47, %v1110_v19 }
 0x133   : > { %v403_v34 = vadd.f32 %v402_v22, %v401_v2  ;;  %v412_v35 = vadd.f32 %v411_v23, %v410_v16  ;;  %v422_v13 = vadd.f32 %v421_v27, %v408_v6  ;;  %v430_v36 = vrot.slane %v427_v28, 4 }
 0x134   : > { %v371_v37 = vrot.slane %v370_v24, 1  ;;  %v418_v14 = vadd.f32 %v417_v25, %v416_v4  ;;  %v436_v17 = vrot.slane %v428_v29, 4  ;;  %v442_v38 = vrot.slane %v429_v15, 4 }
 0x135   : > { %v382_v39 = vadd.f32 %v381_v26, %v380_v5  ;;  %v392_v30 = vrot.slane %v391_v18, 1  ;;  %v423_v33 = vrot.slane %v422_v13, 2  ;;  %v431_v48 = vadd.f32 %v430_v36, %v427_v28 }
 0x136   : > { %v377_v49 = vrot.slane %v376_v20, 1  ;;  %v398_v50 = vrot.slane %v397_v21, 1  ;;  %v437_v51 = vadd.f32 %v436_v17, %v428_v29  ;;  %v443_v52 = vadd.f32 %v442_v38, %v429_v15 }
 0x137   : > { %v404_v53 = vrot.slane %v403_v34, 1  ;;  %v413_v54 = vrot.slane %v412_v35, 1  ;;  %v424_v55 = vadd.f32 %v423_v33, %v422_v13  ;;  %v432_v19 = vrot.slane %v431_v48, 2 }
 0x138   : > { %v419_v56 = vrot.slane %v418_v14, 1  ;;  %v438_v57 = vrot.slane %v437_v51, 2  ;;  %v444_v58 = vrot.slane %v443_v52, 2  ;;  %v372_v59 = vadd.f32 %v371_v37, %v370_v24 }
 0x139   : > { %v383_v60 = vrot.slane %v382_v39, 1  ;;  %v425_v61 = vrot.slane %v424_v55, 1  ;;  %v433_v62 = vadd.f32 %v432_v19, %v431_v48  ;;  %v378_v63 = vadd.f32 %v377_v49, %v376_v20 }
 0x13a   : > { %v393_v0 = vadd.f32 %v392_v30, %v391_v18  ;;  %v439_v1 = vadd.f32 %v438_v57, %v437_v51  ;;  %v445_v2 = vadd.f32 %v444_v58, %v443_v52  ;;  %v399_v16 = vadd.f32 %v398_v50, %v397_v21  ;;  %v450_v50 = vpop.permute.xlu2 %449 }
 0x13b   : > { %v405_v3 = vadd.f32 %v404_v53, %v403_v34  ;;  %v414_v4 = vadd.f32 %v413_v54, %v412_v35  ;;  %v434_v5 = vrot.slane %v433_v62, 1  ;;  %v420_v9 = vadd.f32 %v419_v56, %v418_v14 }
 0x13c   : > { %v440_v6 = vrot.slane %v439_v1, 1  ;;  %v446_v7 = vrot.slane %v445_v2, 1  ;;  %v384_v8 = vadd.f32 %v383_v60, %v382_v39  ;;  %v426_v22 = vadd.f32 %v425_v61, %v424_v55 }
 0x13d   : > { %v435_v23 = vadd.f32 %v434_v5, %v433_v62  ;;  %v1312_v24 = vsub.f32 %v1082_v10, %v372_v59  ;;  %v1315_v27 = vsub.f32 %v1087_v11, %v378_v63  ;;  %v1318_v18 = vsub.f32 %v1082_v10, %v393_v0 }
 0x13e   : > { %v441_v25 = vadd.f32 %v440_v6, %v439_v1  ;;  %v447_v26 = vadd.f32 %v446_v7, %v445_v2  ;;  %v1321_v28 = vsub.f32 %v1087_v11, %v399_v16  ;;  %v1324_v20 = vsub.f32 %v1092_v12, %v405_v3 }
 0x13f   : > { %v1327_v21 = vsub.f32 %v414_v4, %v1082_v10  ;;  %v1330_v29 = vsub.f32 %v420_v9, %v1087_v11  ;;  %v1333_v15 = vsub.f32 %v435_v23, %v1082_v10  ;;  %v825_v13 = vsel %vm304_vm2, 1.0, %v1001_v40 }
 0x140   : > { %v1336_v34 = vsub.f32 %v441_v25, %v1087_v11  ;;  %v1339_v35 = vsub.f32 %v447_v26, %v1092_v12  ;;  %v826_v10 = vsel %vm305_vm3, 1.0, %v1001_v40  ;;  %v1354_v11 = vsub.f32 %v1092_v12, %v384_v8 }
 0x141   : > { %v1357_v36 = vsub.f32 %v426_v22, %v1092_v12  ;;  %v494_v44 = vmax.f32 %v1318_v18, %v1333_v15  ;;  %v614_v37 = vrot.slane %v825_v13, 4  ;;  %v620_v14 = vrot.slane %v826_v10, 4 }
 0x142   : > { %v495_v31 = vmax.f32 %v1321_v28, %v1336_v34  ;;  %v496_v45 = vmax.f32 %v1324_v20, %v1339_v35  ;;  %v488_v12 = vmax.f32 %v1312_v24, %v1327_v21  ;;  %v489_v32 = vmax.f32 %v1315_v27, %v1330_v29 }
 0x143   : > { %v490_v46 = vmax.f32 %v1354_v11, %v1357_v36  ;;  %v515_v40 = vrot.slane %v494_v44, 1  ;;  %v626_v39 = vrot.slane %v827_v41, 4  ;;  %v491_v30 = vmin.f32 %v1318_v18, %v1333_v15 }
 0x144   : > { %v516_v17 = vrot.slane %v495_v31, 1  ;;  %v517_v38 = vrot.slane %v496_v45, 1  ;;  %v492_v51 = vmin.f32 %v1321_v28, %v1336_v34  ;;  %v493_v52 = vmin.f32 %v1324_v20, %v1339_v35 }
 0x145   : > { %v521_v33 = vmul.f32 %v515_v40, %v488_v12  ;;  %v615_v55 = vadd.f32 %v825_v13, %v614_v37  ;;  %v621_v19 = vadd.f32 %v826_v10, %v620_v14  ;;  %v627_v57 = vadd.f32 %v827_v41, %v626_v39 }
 0x146   : > { %v522_v48 = vmul.f32 %v516_v17, %v489_v32  ;;  %v523_v49 = vmul.f32 %v517_v38, %v490_v46  ;;  %v452_v58 = vmul.f32 %v1279_v42, %v450_v50  ;;  %v453_v59 = vmul.f32 %v1282_v43, %v450_v50 }
 0x147   : > { %v524_v53 = vadd.f32 1e-10, %v521_v33  ;;  %v500_v60 = vrot.slane %v491_v30, 1  ;;  %v501_v61 = vrot.slane %v492_v51, 1  ;;  %v502_v62 = vrot.slane %v493_v52, 1 }
 0x148   : > { %v1383_v54 = vadd.f32 1e-10, %v522_v48  ;;  %v1385_v56 = vadd.f32 1e-10, %v523_v49  ;;  %v485_v63 = vmin.f32 %v1312_v24, %v1327_v21  ;;  %v616_v0 = vrot.slane %v615_v55, 2 }
 0x149   : > { %903 = vrcp.f32 %v524_v53  ;;  %v622_v1 = vrot.slane %v621_v19, 2  ;;  %v454_v2 = vmul.f32 %v1289_v47, %v450_v50  ;;  %v486_v42 = vmin.f32 %v1315_v27, %v1330_v29 }
 0x14a   : > { %905 = vrcp.f32 %v1383_v54  ;;  %v487_v43 = vmin.f32 %v1354_v11, %v1357_v36  ;;  %v628_v16 = vrot.slane %v627_v57, 2  ;;  %v455_v3 = vrot.slane %v452_v58, 4 }
 0x14b   : > { %907 = vrcp.f32 %v1385_v56  ;;  %v461_v4 = vrot.slane %v453_v59, 4  ;;  %v506_v5 = vmul.f32 %v500_v60, %v485_v63  ;;  %v507_v9 = vmul.f32 %v501_v61, %v486_v42 }
 0x14c   : > { %v508_v6 = vmul.f32 %v502_v62, %v487_v43  ;;  %v1398_v8 = vadd.f32 %v616_v0, %v615_v55  ;;  %v467_v23 = vrot.slane %v454_v2, 4  ;;  %v1400_v26 = vadd.f32 %v622_v1, %v621_v19 }
 0x14d   : > { %v1402_v47 = vadd.f32 %v628_v16, %v627_v57  ;;  %v456_v10 = vadd.f32 %v455_v3, %v452_v58  ;;  %v462_v41 = vadd.f32 %v461_v4, %v453_v59  ;;  %v509_v44 = vmax.f32 %v506_v5, 0.0 }
 0x14e   : > { %v510_v45 = vmax.f32 %v507_v9, 0.0  ;;  %v511_v37 = vmax.f32 %v508_v6, 0.0  ;;  %vm532_vm11 = vweird.f32 %v524_v53  ;;  %v536_v32 = vand.u32 2147483647, %v524_v53 }
 0x14f   : > { %v904_v7 = vpop.eup %903  ;;  %v538_v46 = vand.u32 2147483648, %v524_v53  ;;  %v553_v38 = vand.u32 2147483648, %v1383_v54  ;;  %v551_v33 = vand.u32 2147483647, %v1383_v54  ;;  %v568_v48 = vand.u32 2147483648, %v1385_v56 }
 0x150   : > { %v906_v22 = vpop.eup %905  ;;  %v528_v25 = vmul.f32 %v904_v7, %v524_v53  ;;  %vm533_vm12 = vweird.f32 %v904_v7  ;;  %v566_v51 = vand.u32 2147483647, %v1385_v56  ;;  %vm537_vm0 = vcmp.eq.f32.partialorder %v536_v32, 8.507059e+37 }
 0x151   : > { %v908_v13 = vpop.eup %907  ;;  %v543_v31 = vmul.f32 %v906_v22, %v1383_v54  ;;  %vm548_vm13 = vweird.f32 %v906_v22  ;;  %vm534_vm15 = vmor %vm532_vm11, %vm533_vm12  ;;  %v539_v52 = vor.u32 1.1754944e-38, %v538_v46  ;;  %vm547_vm1 = vweird.f32 %v1383_v54 }
 0x152   : > { %v529_v14 = vsub.f32 1.0, %v528_v25  ;;  %v558_v12 = vmul.f32 %v908_v13, %v1385_v56  ;;  %vm563_vm14 = vweird.f32 %v908_v13  ;;  %vm549_vm2 = vmor %vm547_vm1, %vm548_vm13  ;;  %v554_v57 = vor.u32 1.1754944e-38, %v553_v38 }
 0x153   : > { %v544_v40 = vsub.f32 1.0, %v543_v31  ;;  %vm562_vm3 = vweird.f32 %v1385_v56  ;;  %vm552_vm4 = vcmp.eq.f32.partialorder %v551_v33, 8.507059e+37  ;;  %v569_v61 = vor.u32 1.1754944e-38, %v568_v48 }
 0x154   : > { %v530_v17 = vmul.f32 %v904_v7, %v529_v14  ;;  %v559_v39 = vsub.f32 1.0, %v558_v12  ;;  %vm564_vm5 = vmor %vm562_vm3, %vm563_vm14  ;;  %vm567_vm6 = vcmp.eq.f32.partialorder %v566_v51, 8.507059e+37  ;;  %v468_v0 = vadd.f32 %v467_v23, %v454_v2 }
 0x155   : > { %v545_v30 = vmul.f32 %v906_v22, %v544_v40  ;;  %v457_v42 = vrot.slane %v456_v10, 2  ;;  %v463_v43 = vrot.slane %v462_v41, 2  ;;  %v618_v56 = vrot.slane %v1398_v8, 1 }
 0x156   : > { %v531_v49 = vadd.f32 %v904_v7, %v530_v17  ;;  %v560_v50 = vmul.f32 %v908_v13, %v559_v39  ;;  %v624_v3 = vrot.slane %v1400_v26, 1  ;;  %v630_v4 = vrot.slane %v1402_v47, 1 }
 0x157   : > { %v546_v55 = vadd.f32 %v906_v22, %v545_v30  ;;  %v469_v2 = vrot.slane %v468_v0, 2  ;;  %v458_v5 = vadd.f32 %v457_v42, %v456_v10  ;;  %v464_v9 = vadd.f32 %v463_v43, %v462_v41 }
 0x158   : > { %v535_v19 = vsel %vm534_vm15, %v904_v7, %v531_v49  ;;  %v561_v58 = vadd.f32 %v908_v13, %v560_v50  ;;  %vm661_vm9 = vcmask 1042432   ;;  %v1427_v7 = vadd.f32 %v618_v56, %v1398_v8 }
 0x159   : > { %v540_v59 = vsel %vm537_vm0, %v539_v52, %v535_v19  ;;  %v550_v60 = vsel %vm549_vm2, %v906_v22, %v546_v55  ;;  %v1430_v22 = vadd.f32 %v624_v3, %v1400_v26  ;;  %v1433_v23 = vadd.f32 %v630_v4, %v1402_v47 }
 0x15a   : > { %v1414_v62 = vmul.f32 %v540_v59, %v509_v44  ;;  %v555_v53 = vsel %vm552_vm4, %v554_v57, %v550_v60  ;;  %v565_v63 = vsel %vm564_vm5, %v908_v13, %v561_v58  ;;  %v638_v25 = vrot.slane %v1327_v21, 6 }
 0x15b   : > { %v1416_v1 = vmul.f32 %v555_v53, %v510_v45  ;;  %v570_v54 = vsel %vm567_vm6, %v569_v61, %v565_v63  ;;  %v470_v44 = vadd.f32 %v469_v2, %v468_v0  ;;  %v639_v10 = vrot.slane %v1330_v29, 6 }
 0x15c   : > { %v1418_v16 = vmul.f32 %v570_v54, %v511_v37  ;;  %909 = vrsqrt.f32 %v1414_v62  ;;  %v654_v41 = vsel %vm653_vm7, %v1312_v24, %v1318_v18  ;;  %v459_v45 = vrot.slane %v458_v5, 1 }
 0x15d   : > { %911 = vrsqrt.f32 %v1416_v1  ;;  %v465_v37 = vrot.slane %v464_v9, 1  ;;  %v655_v47 = vsel %vm653_vm7, %v1315_v27, %v1321_v28  ;;  %v640_v12 = vrot.slane %v1357_v36, 6 }
 0x15e   : > { %913 = vrsqrt.f32 %v1418_v16  ;;  %v647_v29 = vrot.slane %v1333_v15, 6  ;;  %v648_v24 = vrot.slane %v1336_v34, 6  ;;  %v656_v18 = vsel %vm653_vm7, %v1354_v11, %v1324_v20 }
 0x15f   : > { %v658_v46 = vsel %vm657_vm8, %v654_v41, %v638_v25  ;;  %v471_v40 = vrot.slane %v470_v44, 1  ;;  %v659_v28 = vsel %vm657_vm8, %v655_v47, %v639_v10  ;;  %v460_v38 = vadd.f32 %v459_v45, %v458_v5 }
 0x160   : > { %vm632_vm10 = vcmp.ge.f32.partialorder %v1427_v7, 0.5  ;;  %v649_v15 = vrot.slane %v1339_v35, 6  ;;  %v660_v34 = vsel %vm657_vm8, %v656_v18, %v640_v12  ;;  %v662_v20 = vsel %vm661_vm9, %v658_v46, %v647_v29 }
 0x161   : > { %vm633_vm11 = vcmp.ge.f32.partialorder %v1430_v22, 0.5  ;;  %vm634_vm12 = vcmp.ge.f32.partialorder %v1433_v23, 0.5  ;;  %v663_v33 = vsel %vm661_vm9, %v659_v28, %v648_v24  ;;  %v466_v48 = vadd.f32 %v465_v37, %v464_v9 }
 0x162   : > { %v910_v6 = vpop.eup %909  ;;  %v472_v49 = vadd.f32 %v471_v40, %v470_v44  ;;  %v664_v52 = vsel %vm661_vm9, %v660_v34, %v649_v15  ;;  %v665_v55 = vsel %vm632_vm10, %v460_v38, 0.0  ;;  %v677_v19 = vsel %vm632_vm10, %v662_v20, -1.0 }
 0x163   : > { %v912_v13 = vpop.eup %911  ;;  %v573_v31 = vmul.f32 %v910_v6, %v1414_v62  ;;  %vm579_vm13 = vcmp.eq.f32.partialorder %v1414_v62, inf  ;;  %v678_v59 = vsel %vm633_vm11, %v663_v33, -1.0  ;;  %vm581_vm14 = vcmp.eq.f32.partialorder %v1414_v62, 0.0 }
 0x164   : > { %v914_v8 = vpop.eup %913  ;;  %v585_v26 = vmul.f32 %v912_v13, %v1416_v1  ;;  %v582_v60 = vand.u32 2147483648, %v1414_v62  ;;  %vm591_vm15 = vcmp.eq.f32.partialorder %v1416_v1, inf  ;;  %vm593_vm0 = vcmp.eq.f32.partialorder %v1416_v1, 0.0 }
 0x165   : > { %v574_v21 = vmul.f32 %v910_v6, %v573_v31  ;;  %v597_v14 = vmul.f32 %v914_v8, %v1418_v16  ;;  %v594_v63 = vand.u32 2147483648, %v1416_v1  ;;  %vm603_vm1 = vcmp.eq.f32.partialorder %v1418_v16, inf }
 0x166   : > { %v586_v32 = vmul.f32 %v912_v13, %v585_v26  ;;  %v606_v43 = vand.u32 2147483648, %v1418_v16  ;;  %vm605_vm2 = vcmp.eq.f32.partialorder %v1418_v16, 0.0  ;;  %v679_v2 = vsel %vm634_vm12, %v664_v52, -1.0 }
 0x167   : > { %v575_v17 = vmul.f32 0.5, %v574_v21  ;;  %v598_v27 = vmul.f32 %v914_v8, %v597_v14  ;;  %vm704_vm3 = vcmask 1045504   ;;  %v666_v7 = vsel %vm633_vm11, %v466_v48, 0.0 }
 0x168   : > { %v587_v39 = vmul.f32 0.5, %v586_v32  ;;  %v667_v31 = vsel %vm634_vm12, %v472_v49, 0.0  ;;  %v694_v10 = vrot.slane %v679_v2, 6 }
 0x169   : > { %v576_v36 = vsub.f32 1.5, %v575_v17  ;;  %v599_v30 = vmul.f32 0.5, %v598_v27 }
 0x16a   : > { %v588_v11 = vsub.f32 1.5, %v587_v39 }
 0x16b   : > { %v577_v50 = vmul.f32 %v910_v6, %v576_v36  ;;  %v600_v35 = vsub.f32 1.5, %v599_v30 }
 0x16c   : > { %v589_v51 = vmul.f32 %v912_v13, %v588_v11  ;;  %v693_v13 = vrot.slane %v678_v59, 6 }
 0x16d   : > { %v578_v57 = vmul.f32 %v577_v50, %v1414_v62  ;;  %v601_v58 = vmul.f32 %v914_v8, %v600_v35 }
 0x16e   : > { %v590_v61 = vmul.f32 %v589_v51, %v1416_v1 }
 0x16f   : > { %v580_v53 = vsel %vm579_vm13, %v1414_v62, %v578_v57  ;;  %v602_v0 = vmul.f32 %v601_v58, %v1418_v16 }
 0x170   : > { %v583_v54 = vsel %vm581_vm14, %v582_v60, %v580_v53  ;;  %v592_v42 = vsel %vm591_vm15, %v1416_v1, %v590_v61 }
 0x171   : > { %v595_v56 = vsel %vm593_vm0, %v594_v63, %v592_v42  ;;  %v604_v3 = vsel %vm603_vm1, %v1418_v16, %v602_v0  ;;  %v668_v62 = vsel %vm632_vm10, %v583_v54, -1.0  ;;  %v692_v16 = vrot.slane %v677_v19, 6 }
 0x172   : > { %v607_v4 = vsel %vm605_vm2, %v606_v43, %v604_v3  ;;  %v669_v1 = vsel %vm633_vm11, %v595_v56, -1.0  ;;  %v683_v5 = vrot.slane %v668_v62, 7 }
 0x173   : > { %v670_v9 = vsel %vm634_vm12, %v607_v4, -1.0  ;;  %v684_v6 = vrot.slane %v669_v1, 7 }
 0x174   : > { %v685_v25 = vrot.slane %v670_v9, 7  ;;  %v698_v44 = vsel %vm653_vm7, %v665_v55, %v683_v5 }
 0x175   : > { %v699_v41 = vsel %vm653_vm7, %v666_v7, %v684_v6  ;;  %v701_v8 = vsel %vm657_vm8, %v698_v44, %v692_v16 }
 0x176   : > { %v700_v45 = vsel %vm653_vm7, %v667_v31, %v685_v25  ;;  %v702_v22 = vsel %vm657_vm8, %v699_v41, %v693_v13  ;;  %v705_v37 = vsel %vm704_vm3, %v701_v8, 0.0 }
 0x177   : > { %v703_v26 = vsel %vm657_vm8, %v700_v45, %v694_v10  ;;  %v706_v47 = vsel %vm704_vm3, %v702_v22, 0.0  ;;  %708 = vst [vmem:[%s164_s20] sm:$0xff] %v705_v37 }
 0x178   : > { %v707_v23 = vsel %vm704_vm3, %v703_v26, 0.0  ;;  %709 = vst [vmem:[%s164_s20 + $0x8] sm:$0xff] %v706_v47 }
 0x179   : > { %710 = vst [vmem:[%s164_s20 + $0x10] sm:$0xff] %v707_v23 }
 0x17a   : > { %942 = shalt.err (!%p939_p5)
}
 0x17b   : > { %833 = dma.vmem_to_hbm [thread:$0]  (%p1057_p4), %s728_s23, 384, %s730_s24, %s712_s25  }
 0x17c PF: > { %p839_p6 = scmp.ge.s32.totalorder %s993_s14, 2  ;;  %s741_s5 = sand.u32 1, %s973_s9  }
 0x17d   : > { %s742_s6 = scalar_lea.sflag [#allocation3], %s741_s5 }
 0x17e   : > { %p836_p7 = pnand %p839_p6, %p1064_p8 }
 0x180   : > { %p837_p9 = pneg %p836_p7 }
 0x182   : > { %968 = dma.done.wait (%p837_p9), %s742_s6, 384  }
 0x183   : > { %970 = vsyncadd (%p837_p9), %s742_s6, 4294966912  ;;  %s15_s14 = sadd.s32 1, %s993_s14   ;;  %s1577_s9 = smov %s977_s10 }
 0x184   : > { %p12_p10 = scmp.ge.s32.totalorder %s15_s14, 4   ;;  %s1578_s10 = smov %s981_s11 }
 0x185   : > { %s1579_s11 = smov %s1070_s22  ;;  %s1580_s12 = smov %s989_s13 }
 0x186   : > { %s1581_s13 = smov %s1583_s17  ;;  %14 = sbr.rel (!%p12_p10) target bundleno = 4 (0x4), region = 66 }
 0x18b   :  { %748 = vsyncpa [#allocation3], 1 }
 0x18c   :  { %750 = vsyncpa [#allocation3 + $0x1], 1 }

</bundles_post_ra>
